<compile_context>
chip_gen: v6e
topology: v6e:2x2x1
jax: 0.10.0
libtpu: 0.0.40
codegen_flags: <defaults>
</compile_context>

<pallas_src>
import jax
import jax.numpy as jnp
import numpy as np
from jax.experimental import pallas as pl
from jax.experimental.pallas import tpu as pltpu


def _gap_kernel(enc_ref, mask_ref, out_ref, num_acc, den_acc):
    """Grid = (B // bt, C // ct, S); S (innermost) is the reduction axis.

    enc_ref : (bt, 1, ct, HW)  features for one shot, native dtype
    mask_ref: (bt, 1, 1,  HW)  resized mask for the same shot, f32
    out_ref : (bt, ct, HW)     pooled value broadcast over spatial positions
    num_acc : (bt, ct, 1)      f32 masked-sum accumulator (persists across s)
    den_acc : (bt, 1,  1)      f32 mask-sum accumulator
    """
    s = pl.program_id(2)

    @pl.when(s == 0)
    def _init():
        num_acc[...] = jnp.zeros_like(num_acc)
        den_acc[...] = jnp.zeros_like(den_acc)

    enc = enc_ref[...][:, 0].astype(jnp.float32)       # (bt, ct, HW), in-kernel upcast
    m = mask_ref[...][:, 0]                            # (bt, 1, HW), f32

    num_acc[...] += jnp.sum(enc * m, axis=-1, keepdims=True)   # (bt, ct, 1)
    den_acc[...] += jnp.sum(m, axis=-1, keepdims=True)         # (bt, 1, 1)

    @pl.when(s == pl.num_programs(2) - 1)
    def _finalize():
        r = num_acc[...] / den_acc[...]                # (bt, ct, 1)
        # torch.nan_to_num defaults: nan -> 0, +inf -> dtype max, -inf -> dtype min.
        # TODO(synk): torch only applies nan_to_num when a NaN exists somewhere in
        # the tensor; here it is applied unconditionally (differs only in the
        # inf-without-nan corner case).
        big = jnp.float32(jnp.finfo(jnp.float32).max)
        r = jnp.where(jnp.isnan(r), jnp.float32(0.0), r)
        r = jnp.clip(r, -big, big)
        bt, ct, hw = out_ref.shape
        out_ref[...] = jnp.broadcast_to(r, (bt, ct, hw)).astype(out_ref.dtype)


def _pick_c_tile(C, HW, itemsize, budget_bytes):
    """Largest channel tile (full C, or a multiple of 8 dividing C) whose
    double-buffered feature block fits the budget."""
    if 2 * C * HW * itemsize <= budget_bytes or C < 16:
        return C
    ct = max(8, min(C - (C % 8), (budget_bytes // (2 * HW * itemsize)) // 8 * 8))
    while ct > 8 and C % ct != 0:
        ct -= 8
    return ct if (ct >= 8 and C % ct == 0) else C


def _pick_b_tile(B, bytes_per_batch_elem, budget_bytes):
    """Coarsen over batch when a single (ct, HW) block is tiny, to amortize
    the ~0.35us per-grid-step overhead."""
    bt = B
    while bt > 1 and (2 * bt * bytes_per_batch_elem > budget_bytes or B % bt != 0):
        bt -= 1
    return max(bt, 1)


def global_average_pooling_2d(support_annots, support_imgs_encoded,
                              *, vmem_limit_bytes=32 * 1024 * 1024):
    B, S, C, H, W = support_imgs_encoded.shape
    HW = H * W

    # --- glue: resize masks to the encoded spatial size (torchvision Resize) ---
    ann = support_annots[:, :, 0, :, :]                # squeeze(2) -> (B, S, Ha, Wa)
    if ann.shape[-2:] != (H, W):
        # TODO(synk): torchvision Resize on tensors defaults to antialiased bilinear;
        # jax.image.resize 'bilinear' is non-antialiased.
        ann = jax.image.resize(ann, (B, S, H, W), method="bilinear")
    msk = ann.astype(jnp.float32).reshape(B, S, 1, HW)  # small: 1/C of feature bytes

    # Native layout + native dtype: contiguous reshape only, no transpose, no upcast.
    enc = support_imgs_encoded.reshape(B, S, C, HW)
    feat_itemsize = jnp.dtype(enc.dtype).itemsize

    # Keep the double-buffered feature block well under the scoped VMEM limit.
    budget = vmem_limit_bytes // 4
    ct = _pick_c_tile(C, HW, feat_itemsize, budget)
    bt = _pick_b_tile(B, ct * HW * feat_itemsize, budget)

    out_dtype = jnp.promote_types(support_imgs_encoded.dtype, jnp.float32)

    out = pl.pallas_call(
        _gap_kernel,
        out_shape=jax.ShapeDtypeStruct((B, C, HW), out_dtype),
        grid_spec=pltpu.PrefetchScalarGridSpec(
            num_scalar_prefetch=0,
            grid=(B // bt, C // ct, S),
            in_specs=[
                pl.BlockSpec((bt, 1, ct, HW), lambda b, c, s: (b, s, c, 0)),
                pl.BlockSpec((bt, 1, 1, HW), lambda b, c, s: (b, s, 0, 0)),
            ],
            out_specs=pl.BlockSpec((bt, ct, HW), lambda b, c, s: (b, c, 0)),
            scratch_shapes=[
                pltpu.VMEM((bt, ct, 1), jnp.float32),   # masked-sum accumulator
                pltpu.VMEM((bt, 1, 1), jnp.float32),    # mask-sum accumulator
            ],
        ),
        compiler_params=pltpu.CompilerParams(
            dimension_semantics=("parallel", "parallel", "arbitrary"),
            vmem_limit_bytes=vmem_limit_bytes,
        ),
    )(enc, msk)

    return out.reshape(B, C, H, W)


def _reference(support_annots, support_imgs_encoded):
    """Pure-JAX mirror of the PyTorch forward, for validation."""
    B, S, C, H, W = support_imgs_encoded.shape
    ann = support_annots[:, :, 0, :, :]
    if ann.shape[-2:] != (H, W):
        ann = jax.image.resize(ann, (B, S, H, W), method="bilinear")
    ann = jnp.broadcast_to(ann[:, :, None], (B, S, C, H, W)).astype(jnp.float32)
    masked = support_imgs_encoded.astype(jnp.float32) * ann
    num = masked.sum(axis=(1, 3, 4), keepdims=True)
    den = ann.sum(axis=(1, 3, 4), keepdims=True)
    r = jnp.nan_to_num(num / den)[:, 0]                # (B, C, 1, 1)
    return jnp.broadcast_to(r, (B, C, H, W))


if __name__ == "__main__":
    key = jax.random.PRNGKey(0)
    k1, k2 = jax.random.split(key)

    B, S, C, H, W = 2, 3, 4, 16, 16
    Ha, Wa = 32, 32                                    # annot spatial size (resized to 16x16)

    support_annots = (jax.random.uniform(k1, (B, S, 1, Ha, Wa), jnp.float32) > 0.5).astype(jnp.float32)
    support_imgs_encoded = jax.random.normal(k2, (B, S, C, H, W), jnp.float32)

    out = global_average_pooling_2d(support_annots, support_imgs_encoded)
    out = jax.block_until_ready(out)

    ref = _reference(support_annots, support_imgs_encoded)
    np.testing.assert_allclose(np.asarray(out), np.asarray(ref), rtol=1e-5, atol=1e-5)
    assert out.shape == (B, C, H, W)

    print("KERNEL_OK")
</pallas_src>

<mosaic_0001>
module attributes {stable_mosaic.version = 11 : i64} {
  func.func @_gap_kernel(%arg0: i32, %arg1: i32, %arg2: i32, %arg3: memref<2x1x4x256xf32, #tpu.memory_space<vmem>>, %arg4: memref<2x1x1x256xf32, #tpu.memory_space<vmem>>, %arg5: memref<2x4x256xf32, #tpu.memory_space<vmem>>, %arg6: memref<2x4x1xf32, #tpu.memory_space<vmem>>, %arg7: memref<2x1x1xf32, #tpu.memory_space<vmem>>) attributes {dimension_semantics = [#tpu.dimension_semantics<parallel>, #tpu.dimension_semantics<parallel>, #tpu.dimension_semantics<arbitrary>], iteration_bounds = array<i64: 1, 1, 3>, scalar_prefetch = 0 : i64, scratch_operands = 2 : i64, tpu.core_type = #tpu.core_type<tc>, window_params = [{transform_indices = @transform_0, window_bounds = array<i64: 2, 1, 4, 256>}, {transform_indices = @transform_1, window_bounds = array<i64: 2, 1, 1, 256>}, {transform_indices = @transform_2, window_bounds = array<i64: 2, 4, 256>}]} {
    %c0_i32 = arith.constant 0 : i32
    %0 = arith.cmpi eq, %arg2, %c0_i32 : i32
    %1 = arith.extui %0 : i1 to i32
    %c0_i32_0 = arith.constant 0 : i32
    %2 = arith.cmpi ne, %1, %c0_i32_0 : i32
    scf.if %2 {
      %cst_22 = arith.constant 0.000000e+00 : f32
      %22 = vector.broadcast %cst_22 : f32 to vector<2x4x1xf32>
      %c0_23 = arith.constant 0 : index
      %c0_24 = arith.constant 0 : index
      %c0_25 = arith.constant 0 : index
      %23 = vector.load %arg6[%c0_23, %c0_24, %c0_25] : memref<2x4x1xf32, #tpu.memory_space<vmem>>, vector<2x4x1xf32>
      tpu.vector_store %arg6[%c0_23, %c0_24, %c0_25], %22 {strides = array<i32>} : memref<2x4x1xf32, #tpu.memory_space<vmem>>, vector<2x4x1xf32>,
      %cst_26 = arith.constant 0.000000e+00 : f32
      %24 = vector.broadcast %cst_26 : f32 to vector<2x1x1xf32>
      %c0_27 = arith.constant 0 : index
      %c0_28 = arith.constant 0 : index
      %c0_29 = arith.constant 0 : index
      %25 = vector.load %arg7[%c0_27, %c0_28, %c0_29] : memref<2x1x1xf32, #tpu.memory_space<vmem>>, vector<2x1x1xf32>
      tpu.vector_store %arg7[%c0_27, %c0_28, %c0_29], %24 {strides = array<i32>} : memref<2x1x1xf32, #tpu.memory_space<vmem>>, vector<2x1x1xf32>,
    } else {
    }
    %c0 = arith.constant 0 : index
    %c0_1 = arith.constant 0 : index
    %c0_2 = arith.constant 0 : index
    %c0_3 = arith.constant 0 : index
    %3 = vector.load %arg3[%c0, %c0_1, %c0_2, %c0_3] : memref<2x1x4x256xf32, #tpu.memory_space<vmem>>, vector<2x1x4x256xf32>
    %4 = vector.shape_cast %3 : vector<2x1x4x256xf32> to vector<2x4x256xf32>
    %c0_4 = arith.constant 0 : index
    %c0_5 = arith.constant 0 : index
    %c0_6 = arith.constant 0 : index
    %c0_7 = arith.constant 0 : index
    %5 = vector.load %arg4[%c0_4, %c0_5, %c0_6, %c0_7] : memref<2x1x1x256xf32, #tpu.memory_space<vmem>>, vector<2x1x1x256xf32>
    %6 = vector.shape_cast %5 : vector<2x1x1x256xf32> to vector<2x1x256xf32>
    %c0_8 = arith.constant 0 : index
    %c0_9 = arith.constant 0 : index
    %c0_10 = arith.constant 0 : index
    %7 = vector.load %arg6[%c0_8, %c0_9, %c0_10] : memref<2x4x1xf32, #tpu.memory_space<vmem>>, vector<2x4x1xf32>
    %8 = vector.broadcast %6 : vector<2x1x256xf32> to vector<2x4x256xf32>
    %9 = arith.mulf %4, %8 : vector<2x4x256xf32>
    %cst = arith.constant dense<0.000000e+00> : vector<2x4xf32>
    %10 = vector.multi_reduction <add>, %9, %cst [2] : vector<2x4x256xf32> to vector<2x4xf32>
    %11 = vector.shape_cast %10 : vector<2x4xf32> to vector<2x4x1xf32>
    %12 = arith.addf %7, %11 : vector<2x4x1xf32>
    %c0_11 = arith.constant 0 : index
    %c0_12 = arith.constant 0 : index
    %c0_13 = arith.constant 0 : index
    %13 = vector.load %arg6[%c0_11, %c0_12, %c0_13] : memref<2x4x1xf32, #tpu.memory_space<vmem>>, vector<2x4x1xf32>
    tpu.vector_store %arg6[%c0_11, %c0_12, %c0_13], %12 {strides = array<i32>} : memref<2x4x1xf32, #tpu.memory_space<vmem>>, vector<2x4x1xf32>,
    %c0_14 = arith.constant 0 : index
    %c0_15 = arith.constant 0 : index
    %c0_16 = arith.constant 0 : index
    %14 = vector.load %arg7[%c0_14, %c0_15, %c0_16] : memref<2x1x1xf32, #tpu.memory_space<vmem>>, vector<2x1x1xf32>
    %cst_17 = arith.constant dense<0.000000e+00> : vector<2x1xf32>
    %15 = vector.multi_reduction <add>, %6, %cst_17 [2] : vector<2x1x256xf32> to vector<2x1xf32>
    %16 = vector.shape_cast %15 : vector<2x1xf32> to vector<2x1x1xf32>
    %17 = arith.addf %14, %16 : vector<2x1x1xf32>
    %c0_18 = arith.constant 0 : index
    %c0_19 = arith.constant 0 : index
    %c0_20 = arith.constant 0 : index
    %18 = vector.load %arg7[%c0_18, %c0_19, %c0_20] : memref<2x1x1xf32, #tpu.memory_space<vmem>>, vector<2x1x1xf32>
    tpu.vector_store %arg7[%c0_18, %c0_19, %c0_20], %17 {strides = array<i32>} : memref<2x1x1xf32, #tpu.memory_space<vmem>>, vector<2x1x1xf32>,
    %c2_i32 = arith.constant 2 : i32
    %19 = arith.cmpi eq, %arg2, %c2_i32 : i32
    %20 = arith.extui %19 : i1 to i32
    %c0_i32_21 = arith.constant 0 : i32
    %21 = arith.cmpi ne, %20, %c0_i32_21 : i32
    scf.if %21 {
      %c0_22 = arith.constant 0 : index
      %c0_23 = arith.constant 0 : index
      %c0_24 = arith.constant 0 : index
      %22 = vector.load %arg6[%c0_22, %c0_23, %c0_24] : memref<2x4x1xf32, #tpu.memory_space<vmem>>, vector<2x4x1xf32>
      %c0_25 = arith.constant 0 : index
      %c0_26 = arith.constant 0 : index
      %c0_27 = arith.constant 0 : index
      %23 = vector.load %arg7[%c0_25, %c0_26, %c0_27] : memref<2x1x1xf32, #tpu.memory_space<vmem>>, vector<2x1x1xf32>
      %24 = vector.broadcast %23 : vector<2x1x1xf32> to vector<2x4x1xf32>
      %25 = arith.divf %22, %24 : vector<2x4x1xf32>
      %26 = arith.cmpf one, %25, %25 : vector<2x4x1xf32>
      %cst_28 = arith.constant 0.000000e+00 : f32
      %27 = vector.broadcast %cst_28 : f32 to vector<2x4x1xf32>
      %28 = arith.select %26, %27, %25 : vector<2x4x1xi1>, vector<2x4x1xf32>
      %cst_29 = arith.constant 0.000000e+00 : f32
      %cst_30 = arith.constant 3.40282347E+38 : f32
      %29 = arith.subf %cst_29, %cst_30 : f32
      %cst_31 = arith.constant 3.40282347E+38 : f32
      %30 = vector.broadcast %29 : f32 to vector<2x4x1xf32>
      %31 = arith.maximumf %30, %28 : vector<2x4x1xf32>
      %32 = vector.broadcast %cst_31 : f32 to vector<2x4x1xf32>
      %33 = arith.minimumf %32, %31 : vector<2x4x1xf32>
      %34 = vector.shape_cast %33 : vector<2x4x1xf32> to vector<2x4x1xf32>
      %35 = vector.broadcast %34 : vector<2x4x1xf32> to vector<2x4x256xf32>
      %c0_32 = arith.constant 0 : index
      %c0_33 = arith.constant 0 : index
      %c0_34 = arith.constant 0 : index
      %36 = vector.load %arg5[%c0_32, %c0_33, %c0_34] : memref<2x4x256xf32, #tpu.memory_space<vmem>>, vector<2x4x256xf32>
      tpu.vector_store %arg5[%c0_32, %c0_33, %c0_34], %35 {strides = array<i32>} : memref<2x4x256xf32, #tpu.memory_space<vmem>>, vector<2x4x256xf32>,
    } else {
    }
    return
  }
  func.func @transform_0(%arg0: i32, %arg1: i32, %arg2: i32) -> (i32, i32, i32, i32) {
    %c0_i32 = arith.constant 0 : i32
    %c0_i32_0 = arith.constant 0 : i32
    return %arg0, %arg2, %arg1, %c0_i32 : i32, i32, i32, i32
  }
  func.func @transform_1(%arg0: i32, %arg1: i32, %arg2: i32) -> (i32, i32, i32, i32) {
    %c0_i32 = arith.constant 0 : i32
    %c0_i32_0 = arith.constant 0 : i32
    %c0_i32_1 = arith.constant 0 : i32
    return %arg0, %arg2, %c0_i32, %c0_i32_0 : i32, i32, i32, i32
  }
  func.func @transform_2(%arg0: i32, %arg1: i32, %arg2: i32) -> (i32, i32, i32) {
    %c0_i32 = arith.constant 0 : i32
    %c0_i32_0 = arith.constant 0 : i32
    return %arg0, %arg1, %c0_i32 : i32, i32, i32
  }
}

</mosaic_0001>

<bundles_post_ra>
// kernel: tpu_custom_call.1
= control target key start
LH: loop header
LB: loop body
LE: loop exit
PB: predicated region body
PF: predicated region fallthrough
CT: control target
= control target key end

     0   :  { %7 = vsyncpa [#allocation5], 0  ;;  %s915_s0 = inlined_call_operand.hbm [shape: f32[2,3,4,256], index: 0, kind: input, shape index: {}]   ;;  %s916_s1 = inlined_call_operand.hbm [shape: f32[2,3,1,256], index: 1, kind: input, shape index: {}]   ;;  %s917_s2 = inlined_call_operand.hbm [shape: f32[2,4,256], index: 2, kind: output, shape index: {}]  }
   0x1   :  { %9 = vsyncpa [#allocation5 + $0x1], 0 }
   0x2   :  { %10 = vsyncpa [#allocation8], 0 }
   0x3   :  { %12 = vsyncpa [#allocation8 + $0x1], 0 }
   0x4   :  { %13 = vsyncpa [#allocation6], 0  ;;  %s764_s9 = smov 0   ;;  %s766_s10 = smov 0  }
   0x5   :  { %s768_s11 = smov 0   ;;  %s770_s12 = smov 0  }
   0x6   :  { %s772_s13 = smov 0   ;;  %s774_s14 = smov 0  }
   0x7 LB: > { %s488_s15 = sadd.s32 4294967295, %s733_s14   ;;  %s31_s16 = sadd.s32 1, %s729_s13  ;;  %s733_s14 = sphi %s774_s14, %s19_s14   ;;  %s729_s13 = sphi %s772_s13, %s927_s13   ;;  %s725_s12 = sphi %s770_s12, %s926_s12   ;;  %s721_s11 = sphi %s768_s11, %s925_s11   ;;  %s717_s10 = sphi %s766_s10, %s924_s10   ;;  %s713_s9 = sphi %s764_s9, %s923_s9  }
   0x8   : > { %p32_p0 = scmp.ge.s32.totalorder %s31_s16, 3  ;;  %s49_s17 = sadd.s32 1, %s721_s11 }
   0x9   : > { %p56_p1 = scmp.ne.s32.totalorder %s721_s11, %s717_s10  ;;  %p57_p2 = scmp.eq.s32.totalorder %s733_s14, 0 }
   0xa   : > { %s929_s16 = smov (%p32_p0, %s31_s16), 0  ;;  %p62_p4 = scmp.ne.s32.totalorder %s717_s10, %s713_s9 }
   0xb   : > { %p800_p3 = por %p57_p2, %p56_p1  ;;  %s43_s19 = ssub.s32 %s729_s13, %s929_s16 }
   0xc   : > { %p63_p5 = scmp.eq.s32.totalorder %s488_s15, 0  ;;  %p47_p6 = scmp.eq.s32.totalorder %s43_s19, 0 }
   0xd   : > { %p527_p8 = scmp.lt.s32.totalorder %s733_s14, 3  ;;  %s818_s22 = sand.u32 1, %s721_s11  }
   0xe   : > { %p809_p7 = por %p63_p5, %p62_p4  ;;  %s510_s23 = sshll.u32 %s729_s13, 7 }
   0xf   : > { %s815_s21 = scalar_select %p47_p6, %s721_s11, %s49_s17  }
  0x10   : > { %s491_s24 = sshll.u32 %s818_s22, 4  ;;  %s157_s27 = scalar_lea.hbm %s915_s0, %s510_s23 }
  0x11   : > { %s146_s28 = scalar_lea.vmem [#allocation4], %s491_s24  ;;  %p827_p9 = pnand %p527_p8, %p800_p3 }
  0x12   : > { %s158_s29 = sshll.u32 %s146_s28, 4  ;;  %p497_p10 = scmp.ge.s32.totalorder %s733_s14, 1  ;;  %s159_s29 = int_to_ptr.vmem [resolvable:$true] %s158_s29 }
  0x13   : > { %s143_s3 = scalar_lea.sflag [#allocation5], %s818_s22  ;;  %p597_p11 = pneg %p827_p9 }
  0x14   : > { %s608_s4 = scalar_lea.vmem %s159_s29, 256  ;;  %s735_s5 = smov [#allocation4]  }
  0x15   : > { %p609_p12 = scmp.ne.s32.totalorder %s159_s29, %s608_s4  ;;  %s613_s6 = sshll.u32 %s735_s5, 4  ;;  %s614_s6 = int_to_ptr.vmem [resolvable:$false] %s613_s6 }
  0x16   : > { %s615_s7 = scalar_lea.vmem %s614_s6, 512  ;;  %p616_p1 = scmp.lt.s32.totalorder %s159_s29, %s614_s6 }
  0x17   : > { %p611_p13 = pnand %p609_p12, %p597_p11  ;;  %p617_p2 = scmp.lt.s32.totalorder %s615_s7, %s608_s4 }
  0x19   : > { %p612_p0 = pneg %p611_p13  ;;  %p618_p3 = por %p617_p2, %p616_p1 }
  0x1b   : > { %p619_p4 = pnand %p618_p3, %p612_p0 }
  0x1d   : > { %622 = shalt.err (!%p619_p4)
}
  0x1e   : > { %s736_s8 = smov 384   ;;  %s737_s9 = smov 128  }
  0x1f   : > { %s738_s17 = smov 8   ;;  %p190_p5 = scmp.lt.s32.totalorder %s733_s14, 4 }
  0x20   : > { %523 = dma.hbm_to_vmem [thread:$0]  (!%p827_p9), %s157_s27, 256, %s159_s29, %s143_s3, %s736_s8, %s737_s9, %s738_s17  }
  0x21   : > { %s494_s18 = sshll.u32 %s818_s22, 2  ;;  %s511_s19 = sshll.u32 %s729_s13, 5 }
  0x22   : > { %p845_p6 = pnand %p497_p10, %p190_p5  ;;  %s181_s26 = scalar_lea.hbm %s916_s1, %s511_s19 }
  0x23   : > { %s172_s28 = scalar_lea.vmem [#allocation7], %s494_s18  ;;  %s169_s5 = scalar_lea.sflag [#allocation8], %s818_s22 }
  0x24   : > { %s182_s4 = sshll.u32 %s172_s28, 4  ;;  %s739_s27 = smov [#allocation7]   ;;  %s183_s4 = int_to_ptr.vmem [resolvable:$true] %s182_s4 }
  0x25   : > { %s636_s6 = scalar_lea.vmem %s183_s4, 64  ;;  %s641_s29 = sshll.u32 %s739_s27, 4  ;;  %s642_s29 = int_to_ptr.vmem [resolvable:$false] %s641_s29 }
  0x26   : > { %p637_p8 = scmp.ne.s32.totalorder %s183_s4, %s636_s6  ;;  %s643_s3 = scalar_lea.vmem %s642_s29, 128 }
  0x27   : > { %p644_p10 = scmp.lt.s32.totalorder %s183_s4, %s642_s29  ;;  %p645_p0 = scmp.lt.s32.totalorder %s643_s3, %s636_s6 }
  0x28   : > { %p639_p12 = pnand %p637_p8, %p597_p11 }
  0x29   : > { %p646_p1 = por %p645_p0, %p644_p10 }
  0x2a   : > { %p640_p13 = pneg %p639_p12 }
  0x2c   : > { %p647_p2 = pnand %p646_p1, %p640_p13 }
  0x2e   : > { %650 = shalt.err (!%p647_p2)
}
  0x2f   : > { %s740_s7 = smov 96   ;;  %s741_s8 = smov 32  }
  0x30   : > { %s742_s9 = smov 2   ;;  %194 = sbr.rel (%p845_p6) target bundleno = 397 (0x18d), region = 28 }
  0x31   : > { %526 = dma.hbm_to_vmem [thread:$0]  (!%p827_p9), %s181_s26, 64, %s183_s4, %s169_s5, %s740_s7, %s741_s8, %s742_s9  }
  0x32   : > { %s196_s22 = sand.u32 (!%p845_p6), 1, %s717_s10  }
  0x33   : > { %s498_s17 = sshll.u32 (!%p845_p6), %s196_s22, 4  ;;  %s197_s18 = scalar_lea.sflag (!%p845_p6), [#allocation5], %s196_s22 }
  0x34   : > { %s861_s19 = scalar_lea.vmem (!%p845_p6), [#allocation4], %s498_s17 }
  0x35   : > { %700 = dma.done.wait (%p809_p7), %s197_s18, 256  }
  0x36   : > { %702 = vsyncadd (%p809_p7), %s197_s18, 4294967040  ;;  %s499_s24 = sshll.u32 %s196_s22, 2  ;;  %s206_s25 = scalar_lea.sflag [#allocation8], %s196_s22 }
  0x37   : > { %s209_s30 = scalar_lea.vmem [#allocation7], %s499_s24 }
  0x38   : > { %704 = dma.done.wait (%p809_p7), %s206_s25, 64  }
  0x39   : > { %706 = vsyncadd (%p809_p7), %s206_s25, 4294967232  ;;  %p500_p9 = scmp.ne.s32.totalorder %s725_s12, 0 }
  0x3b   : > { %236 = sbr.rel (%p500_p9) target bundleno = 67 (0x43), region = 40 }
  0x40   : > { %vm237_vm0 = vcmask 3072   ;;  %vm240_vm1 = vcmask 0   ;;  %v743_v0 = vmov 0.0  }
  0x41   : > { %238 = vst.msk [vmem:[#allocation2] sm:$0xf] %vm237_vm0, %v743_v0  ;;  %239 = vst.msk [vmem:[#allocation2 + $0x4] sm:$0xf] %vm237_vm0, %v743_v0 }
  0x42   : > { %241 = vst.msk [vmem:[#allocation3] sm:$0x1] %vm240_vm1, %v743_v0  ;;  %242 = vst.msk [vmem:[#allocation3 + $0x1] sm:$0x1] %vm240_vm1, %v743_v0 }
  0x43 PF: > { %v251_v1 = vlaneseq  ;;  %v245_v3 = vld [vmem:[%s209_s30] sm:$0x3]  ;;  %v246_v4 = vld [vmem:[%s209_s30 + $0x2] sm:$0x3]  ;;  %vm301_vm2 = vcmask 1040384   ;;  %v244_v16 = vld [vmem:[%s861_s19 + $0x8] sm:$0xff] }
  0x44   : > { %v243_v11 = vld [vmem:[%s861_s19] sm:$0xff]  ;;  %vm279_vm3 = vcmask 1043456   ;;  %vm314_vm4 = vcmask 0   ;;  %vm292_vm5 = vcmask 3072   ;;  %p501_p7 = scmp.ne.s32.totalorder %s725_s12, 2 }
  0x45   : > { %v872_v2 = vshrl.u32 %v251_v1, 7 }
  0x47   : > { %v253_v5 = vsub.s32 0, %v872_v2  ;;  %v257_v6 = vsub.s32 1, %v872_v2 }
  0x48   : > { %v247_v35 = vld [vmem:[#allocation2] sm:$0xf]  ;;  %v248_v40 = vld [vmem:[#allocation2 + $0x4] sm:$0xf] }
  0x49   : > { %v254_v7 = vrot.slane %v245_v3, %v253_v5  ;;  %v258_v8 = vrot.slane %v245_v3, %v257_v6  ;;  %v262_v9 = vrot.slane %v246_v4, %v253_v5  ;;  %v266_v10 = vrot.slane %v246_v4, %v257_v6  ;;  %v295_v31 = vld [vmem:[#allocation3] sm:$0x1]  ;;  %v296_v34 = vld [vmem:[#allocation3 + $0x1] sm:$0x1] }
  0x4b   : > { %v302_v12 = vsel %vm301_vm2, %v254_v7, 0.0  ;;  %v303_v13 = vsel %vm301_vm2, %v258_v8, 0.0  ;;  %v267_v14 = vcombine.low %v254_v7, %v258_v8  ;;  %v307_v15 = vsel %vm301_vm2, %v262_v9, 0.0 }
  0x4c   : > { %v304_v17 = vadd.f32 %v303_v13, %v302_v12  ;;  %v308_v18 = vsel %vm301_vm2, %v266_v10, 0.0  ;;  %v268_v19 = vcombine.low %v262_v9, %v266_v10 }
  0x4d   : > { %v271_v20 = vmul.f32 %v267_v14, %v243_v11  ;;  %v309_v21 = vadd.f32 %v308_v18, %v307_v15 }
  0x4e   : > { %305 = vadd.xlane.f32.xlu1 %v304_v17  ;;  %v272_v22 = vmul.f32 %v268_v19, %v244_v16 }
  0x4f   : > { %v275_v23 = vcombine.high %v271_v20, %v271_v20  ;;  %v280_v24 = vsel %vm279_vm3, %v271_v20, 0.0 }
  0x50   : > { %v276_v25 = vcombine.high %v272_v22, %v272_v22  ;;  %v285_v27 = vsel %vm279_vm3, %v272_v22, 0.0 }
  0x51   : > { %v281_v26 = vsel %vm279_vm3, %v275_v23, 0.0 }
  0x52   : > { %v282_v28 = vadd.f32 %v281_v26, %v280_v24  ;;  %310 = vadd.xlane.f32.xlu1 %v309_v21  ;;  %v286_v29 = vsel %vm279_vm3, %v276_v25, 0.0 }
  0x53   : > { %v287_v30 = vadd.f32 %v286_v29, %v285_v27 }
  0x54   : > { %283 = vadd.xlane.f32.xlu0 %v282_v28 }
  0x58   : > { %288 = vadd.xlane.f32.xlu0 %v287_v30 }
  0xd7   : > { %v306_v32 = vpop.xlane.xlu1 %305 }
  0xd8   : > { %v312_v33 = vadd.f32 %v306_v32, %v295_v31 }
  0xda   : > { %315 = vst.msk [vmem:[#allocation3] sm:$0x1] %vm314_vm4, %v312_v33 }
  0xdb   : > { %v311_v36 = vpop.xlane.xlu1 %310 }
  0xdc   : > { %v313_v37 = vadd.f32 %v311_v36, %v296_v34 }
  0xdd   : > { %v284_v38 = vpop.xlane.xlu0 %283 }
  0xde   : > { %v290_v39 = vadd.f32 %v284_v38, %v247_v35  ;;  %316 = vst.msk [vmem:[#allocation3 + $0x1] sm:$0x1] %vm314_vm4, %v313_v37 }
  0xe0   : > { %293 = vst.msk [vmem:[#allocation2] sm:$0xf] %vm292_vm5, %v290_v39  ;;  %320 = sbr.rel (%p501_p7) target bundleno = 381 (0x17d), region = 44 }
  0xe1   : > { %v289_v41 = vpop.xlane.xlu0 %288 }
  0xe2   : > { %v291_v42 = vadd.f32 %v289_v41, %v248_v40 }
  0xe4   : > { %294 = vst.msk [vmem:[#allocation2 + $0x4] sm:$0xf] %vm292_vm5, %v291_v42 }
  0xe5   : > { %v502_v43 = vld [vmem:[#allocation3] ss:$0 sm:$0xff]  ;;  %v744_v44 = vmov 0   ;;  %v503_v45 = vld [vmem:[#allocation3 + $0x1] ss:$0 sm:$0xff] }
  0xe6   : > { %590 = vset.pattern.permute.xlu0 %v744_v44  ;;  %591 = vrcp.f32 %v502_v43  ;;  %v745_v56 = vmov 839922192  }
  0xe7   : > { %593 = vrcp.f32 %v503_v45  ;;  %v321_v46 = vld [vmem:[#allocation2] sm:$0xf]  ;;  %v358_v57 = vunpack.c.l.s4 %v745_v56 }
  0xe9   : > { %v359_v58 = vunpack.c.0.s8 %v358_v57 }
  0xeb   : > { %v322_v47 = vld [vmem:[#allocation2 + $0x4] sm:$0xf]  ;;  %v362_v59 = vsub.s32 %v359_v58, %v872_v2 }
  0xf3   : > { %v592_v48 = vpop.eup %591 }
  0xf4   : > { %v594_v49 = vpop.eup %593  ;;  %v338_v50 = vmul.f32 %v592_v48, %v321_v46 }
  0xf5   : > { %v340_v51 = vmul.f32 %v594_v49, %v322_v47 }
  0xf6   : > { %vm341_vm6 = vcmp.ne.f32.partialorder %v338_v50, %v338_v50 }
  0xf7   : > { %v343_v52 = vsel %vm341_vm6, 0.0, %v338_v50  ;;  %vm342_vm7 = vcmp.ne.f32.partialorder %v340_v51, %v340_v51 }
  0xf8   : > { %v504_v53 = vclamps-f32 %v343_v52, 3.4028235e+38  ;;  %v344_v54 = vsel %vm342_vm7, 0.0, %v340_v51 }
  0xf9   : > { %v505_v55 = vclamps-f32 %v344_v54, 3.4028235e+38 }
  0xfa   : > { %351 = vperm.xlu0 %590, %v504_v53  }
  0xfe   : > { %355 = vperm.xlu0 %590, %v505_v55  }
 0x175   : > { %v352_v60 = vpop.permute.xlu0 %351 }
 0x176   : > { %v363_v61 = vrot.slane %v352_v60, %v362_v59 }
 0x178   : > { %373 = vst [vmem:[#allocation9] sm:$0xff] %v363_v61 }
 0x179   : > { %v356_v62 = vpop.permute.xlu0 %355 }
 0x17a   : > { %v370_v63 = vrot.slane %v356_v62, %v362_v59 }
 0x17c   : > { %374 = vst [vmem:[#allocation9 + $0x8] sm:$0xff] %v370_v63 }
 0x17d PF: > { %p882_p11 = scmp.eq.s32.totalorder %s488_s15, 2  ;;  %s746_s20 = smov [#allocation9]  }
 0x17e   : > { %s387_s23 = sshll.u32 %s746_s20, 4  ;;  %s388_s23 = int_to_ptr.vmem [resolvable:$true] %s387_s23 }
 0x17f   : > { %s651_s26 = scalar_lea.vmem %s388_s23, 256  ;;  %p658_p6 = scmp.lt.s32.totalorder %s388_s23, %s388_s23 }
 0x180   : > { %p652_p3 = scmp.ne.s32.totalorder %s388_s23, %s651_s26  ;;  %p659_p8 = scmp.lt.s32.totalorder %s651_s26, %s651_s26 }
 0x182   : > { %p653_p4 = pnand %p652_p3, %p882_p11  ;;  %p660_p12 = por %p659_p8, %p658_p6 }
 0x184   : > { %p654_p5 = pneg %p653_p4 }
 0x186   : > { %p661_p13 = pnand %p660_p12, %p654_p5 }
 0x188   : > { %664 = shalt.err (!%p661_p13)
}
 0x189   : > { %s747_s28 = smov 128   ;;  %s748_s15 = smov 8  }
 0x18a   : > { %517 = dma.vmem_to_hbm [thread:$0]  (%p882_p11), %s388_s23, 256, %s917_s2, [#allocation6], %s747_s28, %s747_s28, %s748_s15  }
 0x18b   : > { %708 = dma.done.wait (%p882_p11), [#allocation6], 256  }
 0x18c   : > { %710 = vsyncadd (%p882_p11), [#allocation6], 4294967040 }
 0x18d PF: > { %s19_s14 = sadd.s32 1, %s733_s14   ;;  %s923_s9 = smov %s717_s10 }
 0x18e   : > { %p16_p10 = scmp.ge.s32.totalorder %s19_s14, 5   ;;  %s924_s10 = smov %s721_s11 }
 0x18f   : > { %s925_s11 = smov %s815_s21  ;;  %s926_s12 = smov %s729_s13 }
 0x190   : > { %s927_s13 = smov %s929_s16  ;;  %18 = sbr.rel (!%p16_p10) target bundleno = 7 (0x7), region = 87 }
 0x195   :  { %403 = vsyncpa [#allocation5], 1 }
 0x196   :  { %405 = vsyncpa [#allocation5 + $0x1], 1 }
 0x197   :  { %406 = vsyncpa [#allocation8], 1 }
 0x198   :  { %408 = vsyncpa [#allocation8 + $0x1], 1 }
 0x199   :  { %409 = vsyncpa [#allocation6], 1 }
 0x19a   :  { %411 = vsyncpa [#allocation6 + $0x1], 1 }

</bundles_post_ra>
